<compile_context>
chip_gen: v7x
topology: tpu7x:2x2x1
jax: 0.10.0
libtpu: 0.0.40
codegen_flags: <defaults>
</compile_context>

<pallas_src>
import functools

import jax
import jax.numpy as jnp
from jax.experimental import pallas as pl
from jax.experimental.pallas import tpu as pltpu

DEFAULT_EPS = 1e-6
_LANE = 128

# Conservative VMEM sizing: v7x has only 64 MiB physical VMEM, so keep the
# requested scoped limit and the tile budget well below that.
_VMEM_LIMIT_BYTES = 48 * 1024 * 1024   # scoped VMEM we ask the compiler for
_VMEM_TILE_BUDGET = 40 * 1024 * 1024   # budget used to size the row tile
_MAX_ROW_TILE = 1024


def _sublane_quantum(dtype):
    itemsize = jnp.dtype(dtype).itemsize
    return 8 if itemsize >= 4 else 32 // itemsize   # f32 -> 8, bf16 -> 16, i8 -> 32


def _pick_row_tile(n_rows, width, dtype):
    """Largest row tile that fits the VMEM budget, multiple of the sublane quantum."""
    itemsize = jnp.dtype(dtype).itemsize
    # per row: (input + output) blocks, double buffered, plus ~3 f32 temporaries
    bytes_per_row = width * (4 * itemsize + 3 * 4)
    tr = _VMEM_TILE_BUDGET // max(1, bytes_per_row)
    q = _sublane_quantum(dtype)
    tr = max(q, min(_MAX_ROW_TILE, (tr // q) * q))
    rows_q = ((n_rows + q - 1) // q) * q            # never tile beyond padded rows
    return min(tr, rows_q)


def _pad_rows(x2, tr):
    rows = x2.shape[0]
    pad = (-rows) % tr
    if pad:
        x2 = jnp.pad(x2, ((0, pad), (0, 0)))
    return x2, rows


# ---------------------------------------------------------------------------
# Standard path: (rows, D) tiles, D is already lane-friendly (>= 128)
# ---------------------------------------------------------------------------
def _layernorm_kernel(x_ref, g_ref, b_ref, o_ref, *, eps):
    y = x_ref[...].astype(jnp.float32)                  # stats in f32
    mean = jnp.mean(y, axis=-1, keepdims=True)
    yc = y - mean
    var = jnp.mean(yc * yc, axis=-1, keepdims=True)
    inv = jax.lax.rsqrt(var + eps)
    out = (yc * inv) * g_ref[...].astype(jnp.float32) + b_ref[...].astype(jnp.float32)
    o_ref[...] = out.astype(o_ref.dtype)


def _layernorm_rows(x2, gamma, beta, eps):
    rows, d = x2.shape
    tr = _pick_row_tile(rows, d, x2.dtype)
    x2p, orig_rows = _pad_rows(x2, tr)
    prows = x2p.shape[0]
    g2 = gamma.reshape(1, d)
    b2 = beta.reshape(1, d)

    out = pl.pallas_call(
        functools.partial(_layernorm_kernel, eps=eps),
        out_shape=jax.ShapeDtypeStruct((prows, d), x2.dtype),
        grid_spec=pltpu.PrefetchScalarGridSpec(
            num_scalar_prefetch=0,
            grid=(prows // tr,),
            in_specs=[
                pl.BlockSpec((tr, d), lambda i: (i, 0)),   # x tile (streamed)
                pl.BlockSpec((1, d), lambda i: (0, 0)),    # gamma (resident)
                pl.BlockSpec((1, d), lambda i: (0, 0)),    # beta  (resident)
            ],
            out_specs=pl.BlockSpec((tr, d), lambda i: (i, 0)),
        ),
        compiler_params=pltpu.CompilerParams(
            dimension_semantics=("parallel",),
            vmem_limit_bytes=_VMEM_LIMIT_BYTES,
        ),
    )(x2p, g2, b2)
    return out[:orig_rows]


# ---------------------------------------------------------------------------
# Narrow-D path: fold G = 128 // D rows into one 128-lane super-row so the
# output store is lane-dense; LayerNorm reduction becomes a segmented
# reduction implemented with tiny 0/1 matmuls (exactness via HIGHEST precision).
# ---------------------------------------------------------------------------
def _layernorm_folded_kernel(x_ref, g_ref, b_ref, s_ref, st_ref, o_ref, *, d, eps):
    y = x_ref[...].astype(jnp.float32)                  # (tr, G*d), lane-dense
    s = s_ref[...]                                      # (G*d, G) segment indicator
    st = st_ref[...]                                    # (G, G*d) its transpose
    inv_d = jnp.float32(1.0 / d)
    hi = jax.lax.Precision.HIGHEST

    mean = jnp.dot(y, s, precision=hi, preferred_element_type=jnp.float32) * inv_d
    mean_full = jnp.dot(mean, st, precision=hi, preferred_element_type=jnp.float32)
    yc = y - mean_full
    var = jnp.dot(yc * yc, s, precision=hi, preferred_element_type=jnp.float32) * inv_d
    inv = jax.lax.rsqrt(var + eps)
    inv_full = jnp.dot(inv, st, precision=hi, preferred_element_type=jnp.float32)

    out = (yc * inv_full) * g_ref[...].astype(jnp.float32) + b_ref[...].astype(jnp.float32)
    o_ref[...] = out.astype(o_ref.dtype)


def _layernorm_rows_folded(x2, gamma, beta, eps):
    rows, d = x2.shape
    g = _LANE // d                                       # rows folded per super-row
    pad = (-rows) % g
    xg = jnp.pad(x2, ((0, pad), (0, 0))) if pad else x2
    srows = xg.shape[0] // g
    xf = xg.reshape(srows, g * d)                        # lane-dense layout

    tr = _pick_row_tile(srows, g * d, x2.dtype)
    xfp, orig_srows = _pad_rows(xf, tr)
    psrows = xfp.shape[0]

    gf = jnp.tile(gamma.reshape(1, d), (1, g))           # (1, g*d)
    bf = jnp.tile(beta.reshape(1, d), (1, g))
    seg = (jnp.arange(g * d)[:, None] // d == jnp.arange(g)[None, :]).astype(jnp.float32)
    seg_t = seg.T

    out = pl.pallas_call(
        functools.partial(_layernorm_folded_kernel, d=d, eps=eps),
        out_shape=jax.ShapeDtypeStruct((psrows, g * d), x2.dtype),
        grid_spec=pltpu.PrefetchScalarGridSpec(
            num_scalar_prefetch=0,
            grid=(psrows // tr,),
            in_specs=[
                pl.BlockSpec((tr, g * d), lambda i: (i, 0)),   # folded x tile
                pl.BlockSpec((1, g * d), lambda i: (0, 0)),    # gamma (tiled, resident)
                pl.BlockSpec((1, g * d), lambda i: (0, 0)),    # beta
                pl.BlockSpec((g * d, g), lambda i: (0, 0)),    # segment matrix
                pl.BlockSpec((g, g * d), lambda i: (0, 0)),    # its transpose
            ],
            out_specs=pl.BlockSpec((tr, g * d), lambda i: (i, 0)),
        ),
        compiler_params=pltpu.CompilerParams(
            dimension_semantics=("parallel",),
            vmem_limit_bytes=_VMEM_LIMIT_BYTES,
        ),
    )(xfp, gf, bf, seg, seg_t)

    out = out[:orig_srows].reshape(orig_srows * g, d)[:rows]
    return out


# ---------------------------------------------------------------------------
# Public wrapper: LayerNorm over the last dim of x (any leading shape)
# ---------------------------------------------------------------------------
def layer_normalization(x, gamma, beta, eps=DEFAULT_EPS):
    d = x.shape[-1]
    lead = x.shape[:-1]
    rows = 1
    for s in lead:
        rows *= s
    x2 = x.reshape(rows, d)

    if d < _LANE and _LANE % d == 0:
        try:
            out2 = jax.block_until_ready(_layernorm_rows_folded(x2, gamma, beta, eps))
        except Exception:
            # Fallback to the plain path if the folded variant fails to lower
            # on this backend; masked stores but numerically identical result.
            out2 = _layernorm_rows(x2, gamma, beta, eps)
    else:
        out2 = _layernorm_rows(x2, gamma, beta, eps)
    return out2.reshape(*lead, d)


if __name__ == "__main__":
    def ref_ln(x, g, b, eps=DEFAULT_EPS):
        mean = jnp.mean(x, axis=-1, keepdims=True)
        var = jnp.mean((x - mean) ** 2, axis=-1, keepdims=True)
        return (x - mean) / jnp.sqrt(var + eps) * g + b

    k1, k2 = jax.random.split(jax.random.PRNGKey(0))

    # 1) Shapes implied by the module's typical use: (batch, seq, d_model)
    B, S, D = 2, 8, 32
    x = jax.random.normal(k1, (B, S, D), dtype=jnp.float32)
    gamma = 1.0 + 0.05 * jnp.arange(D, dtype=jnp.float32)   # non-trivial affine
    beta = 0.1 * jnp.arange(D, dtype=jnp.float32) - 0.5

    out = jax.block_until_ready(layer_normalization(x, gamma, beta))
    ref = ref_ln(x, gamma, beta)
    assert out.shape == x.shape
    assert jnp.allclose(out, ref, atol=2e-3, rtol=2e-3), "mismatch (narrow-D path)"

    # 2) Also exercise the lane-aligned path with a transformer-like width
    D2 = 512
    x2 = jax.random.normal(k2, (B, S, D2), dtype=jnp.float32)
    g2 = jnp.ones((D2,), dtype=jnp.float32)
    b2 = jnp.zeros((D2,), dtype=jnp.float32)
    out2 = jax.block_until_ready(layer_normalization(x2, g2, b2))
    ref2 = ref_ln(x2, g2, b2)
    assert jnp.allclose(out2, ref2, atol=1e-5, rtol=1e-5), "mismatch (wide-D path)"

    print("KERNEL_OK")
</pallas_src>

<mosaic_0001>
module attributes {stable_mosaic.version = 11 : i64} {
  func.func @_layernorm_folded_kernel(%arg0: i32, %arg1: memref<8x128xf32, #tpu.memory_space<vmem>>, %arg2: memref<1x128xf32, #tpu.memory_space<vmem>>, %arg3: memref<1x128xf32, #tpu.memory_space<vmem>>, %arg4: memref<128x4xf32, #tpu.memory_space<vmem>>, %arg5: memref<4x128xf32, #tpu.memory_space<vmem>>, %arg6: memref<8x128xf32, #tpu.memory_space<vmem>>) attributes {dimension_semantics = [#tpu.dimension_semantics<parallel>], iteration_bounds = array<i64: 1>, scalar_prefetch = 0 : i64, scratch_operands = 0 : i64, tpu.core_type = #tpu.core_type<tc>, window_params = [{transform_indices = @transform_0, window_bounds = array<i64: 8, 128>}, {pipeline_mode = #tpu.pipeline_mode<synchronous>, transform_indices = @transform_1, window_bounds = array<i64: 1, 128>}, {pipeline_mode = #tpu.pipeline_mode<synchronous>, transform_indices = @transform_2, window_bounds = array<i64: 1, 128>}, {pipeline_mode = #tpu.pipeline_mode<synchronous>, transform_indices = @transform_3, window_bounds = array<i64: 128, 4>}, {pipeline_mode = #tpu.pipeline_mode<synchronous>, transform_indices = @transform_4, window_bounds = array<i64: 4, 128>}, {transform_indices = @transform_5, window_bounds = array<i64: 8, 128>}]} {
    %c0 = arith.constant 0 : index
    %c0_0 = arith.constant 0 : index
    %0 = vector.load %arg1[%c0, %c0_0] : memref<8x128xf32, #tpu.memory_space<vmem>>, vector<8x128xf32>
    %c0_1 = arith.constant 0 : index
    %c0_2 = arith.constant 0 : index
    %1 = vector.load %arg4[%c0_1, %c0_2] : memref<128x4xf32, #tpu.memory_space<vmem>>, vector<128x4xf32>
    %c0_3 = arith.constant 0 : index
    %c0_4 = arith.constant 0 : index
    %2 = vector.load %arg5[%c0_3, %c0_4] : memref<4x128xf32, #tpu.memory_space<vmem>>, vector<4x128xf32>
    %cst = arith.constant dense<0.000000e+00> : vector<8x4xf32>
    %3 = tpu.matmul %0, %1, %cst {dimension_numbers = #tpu.dot_dimension_numbers<[1], [0], [0], [1], [0, 0, 1, 1], [], []>, precision = #tpu.contract_precision<fp32>} : vector<8x128xf32>, vector<128x4xf32>, vector<8x4xf32> -> vector<8x4xf32>
    %cst_5 = arith.constant 3.125000e-02 : f32
    %4 = vector.broadcast %cst_5 : f32 to vector<8x4xf32>
    %5 = arith.mulf %3, %4 : vector<8x4xf32>
    %cst_6 = arith.constant dense<0.000000e+00> : vector<8x128xf32>
    %6 = tpu.matmul %5, %2, %cst_6 {dimension_numbers = #tpu.dot_dimension_numbers<[1], [0], [0], [1], [0, 0, 1, 1], [], []>, precision = #tpu.contract_precision<fp32>} : vector<8x4xf32>, vector<4x128xf32>, vector<8x128xf32> -> vector<8x128xf32>
    %7 = arith.subf %0, %6 : vector<8x128xf32>
    %8 = arith.mulf %7, %7 : vector<8x128xf32>
    %cst_7 = arith.constant dense<0.000000e+00> : vector<8x4xf32>
    %9 = tpu.matmul %8, %1, %cst_7 {dimension_numbers = #tpu.dot_dimension_numbers<[1], [0], [0], [1], [0, 0, 1, 1], [], []>, precision = #tpu.contract_precision<fp32>} : vector<8x128xf32>, vector<128x4xf32>, vector<8x4xf32> -> vector<8x4xf32>
    %cst_8 = arith.constant 3.125000e-02 : f32
    %10 = vector.broadcast %cst_8 : f32 to vector<8x4xf32>
    %11 = arith.mulf %9, %10 : vector<8x4xf32>
    %cst_9 = arith.constant 9.99999997E-7 : f32
    %12 = vector.broadcast %cst_9 : f32 to vector<8x4xf32>
    %13 = arith.addf %11, %12 : vector<8x4xf32>
    %14 = math.rsqrt %13 : vector<8x4xf32>
    %cst_10 = arith.constant dense<0.000000e+00> : vector<8x128xf32>
    %15 = tpu.matmul %14, %2, %cst_10 {dimension_numbers = #tpu.dot_dimension_numbers<[1], [0], [0], [1], [0, 0, 1, 1], [], []>, precision = #tpu.contract_precision<fp32>} : vector<8x4xf32>, vector<4x128xf32>, vector<8x128xf32> -> vector<8x128xf32>
    %16 = arith.mulf %7, %15 : vector<8x128xf32>
    %c0_11 = arith.constant 0 : index
    %c0_12 = arith.constant 0 : index
    %17 = vector.load %arg2[%c0_11, %c0_12] : memref<1x128xf32, #tpu.memory_space<vmem>>, vector<1x128xf32>
    %18 = vector.broadcast %17 : vector<1x128xf32> to vector<8x128xf32>
    %19 = arith.mulf %16, %18 : vector<8x128xf32>
    %c0_13 = arith.constant 0 : index
    %c0_14 = arith.constant 0 : index
    %20 = vector.load %arg3[%c0_13, %c0_14] : memref<1x128xf32, #tpu.memory_space<vmem>>, vector<1x128xf32>
    %21 = vector.broadcast %20 : vector<1x128xf32> to vector<8x128xf32>
    %22 = arith.addf %19, %21 : vector<8x128xf32>
    %c0_15 = arith.constant 0 : index
    %c0_16 = arith.constant 0 : index
    %23 = vector.load %arg6[%c0_15, %c0_16] : memref<8x128xf32, #tpu.memory_space<vmem>>, vector<8x128xf32>
    tpu.vector_store %arg6[%c0_15, %c0_16], %22 {strides = array<i32>} : memref<8x128xf32, #tpu.memory_space<vmem>>, vector<8x128xf32>,
    return
  }
  func.func @transform_0(%arg0: i32) -> (i32, i32) {
    %c0_i32 = arith.constant 0 : i32
    %c0_i32_0 = arith.constant 0 : i32
    return %arg0, %c0_i32 : i32, i32
  }
  func.func @transform_1(%arg0: i32) -> (i32, i32) {
    %c0_i32 = arith.constant 0 : i32
    %c0_i32_0 = arith.constant 0 : i32
    %c0_i32_1 = arith.constant 0 : i32
    return %c0_i32, %c0_i32_0 : i32, i32
  }
  func.func @transform_2(%arg0: i32) -> (i32, i32) {
    %c0_i32 = arith.constant 0 : i32
    %c0_i32_0 = arith.constant 0 : i32
    %c0_i32_1 = arith.constant 0 : i32
    return %c0_i32, %c0_i32_0 : i32, i32
  }
  func.func @transform_3(%arg0: i32) -> (i32, i32) {
    %c0_i32 = arith.constant 0 : i32
    %c0_i32_0 = arith.constant 0 : i32
    %c0_i32_1 = arith.constant 0 : i32
    return %c0_i32, %c0_i32_0 : i32, i32
  }
  func.func @transform_4(%arg0: i32) -> (i32, i32) {
    %c0_i32 = arith.constant 0 : i32
    %c0_i32_0 = arith.constant 0 : i32
    %c0_i32_1 = arith.constant 0 : i32
    return %c0_i32, %c0_i32_0 : i32, i32
  }
  func.func @transform_5(%arg0: i32) -> (i32, i32) {
    %c0_i32 = arith.constant 0 : i32
    %c0_i32_0 = arith.constant 0 : i32
    return %arg0, %c0_i32 : i32, i32
  }
}

module attributes {stable_mosaic.version = 11 : i64} {
  func.func @_layernorm_kernel(%arg0: i32, %arg1: memref<16x32xf32, #tpu.memory_space<vmem>>, %arg2: memref<1x32xf32, #tpu.memory_space<vmem>>, %arg3: memref<1x32xf32, #tpu.memory_space<vmem>>, %arg4: memref<16x32xf32, #tpu.memory_space<vmem>>) attributes {dimension_semantics = [#tpu.dimension_semantics<parallel>], iteration_bounds = array<i64: 1>, scalar_prefetch = 0 : i64, scratch_operands = 0 : i64, tpu.core_type = #tpu.core_type<tc>, window_params = [{transform_indices = @transform_0, window_bounds = array<i64: 16, 32>}, {pipeline_mode = #tpu.pipeline_mode<synchronous>, transform_indices = @transform_1, window_bounds = array<i64: 1, 32>}, {pipeline_mode = #tpu.pipeline_mode<synchronous>, transform_indices = @transform_2, window_bounds = array<i64: 1, 32>}, {transform_indices = @transform_3, window_bounds = array<i64: 16, 32>}]} {
    %c0 = arith.constant 0 : index
    %c0_0 = arith.constant 0 : index
    %0 = vector.load %arg1[%c0, %c0_0] : memref<16x32xf32, #tpu.memory_space<vmem>>, vector<16x32xf32>
    %cst = arith.constant dense<0.000000e+00> : vector<16xf32>
    %1 = vector.multi_reduction <add>, %0, %cst [1] : vector<16x32xf32> to vector<16xf32>
    %2 = vector.shape_cast %1 : vector<16xf32> to vector<16x1xf32>
    %cst_1 = arith.constant 3.200000e+01 : f32
    %3 = vector.broadcast %cst_1 : f32 to vector<16x1xf32>
    %4 = arith.divf %2, %3 : vector<16x1xf32>
    %5 = vector.broadcast %4 : vector<16x1xf32> to vector<16x32xf32>
    %6 = arith.subf %0, %5 : vector<16x32xf32>
    %7 = arith.mulf %6, %6 : vector<16x32xf32>
    %cst_2 = arith.constant dense<0.000000e+00> : vector<16xf32>
    %8 = vector.multi_reduction <add>, %7, %cst_2 [1] : vector<16x32xf32> to vector<16xf32>
    %9 = vector.shape_cast %8 : vector<16xf32> to vector<16x1xf32>
    %cst_3 = arith.constant 3.200000e+01 : f32
    %10 = vector.broadcast %cst_3 : f32 to vector<16x1xf32>
    %11 = arith.divf %9, %10 : vector<16x1xf32>
    %cst_4 = arith.constant 9.99999997E-7 : f32
    %12 = vector.broadcast %cst_4 : f32 to vector<16x1xf32>
    %13 = arith.addf %11, %12 : vector<16x1xf32>
    %14 = math.rsqrt %13 : vector<16x1xf32>
    %15 = vector.broadcast %14 : vector<16x1xf32> to vector<16x32xf32>
    %16 = arith.mulf %6, %15 : vector<16x32xf32>
    %c0_5 = arith.constant 0 : index
    %c0_6 = arith.constant 0 : index
    %17 = vector.load %arg2[%c0_5, %c0_6] : memref<1x32xf32, #tpu.memory_space<vmem>>, vector<1x32xf32>
    %18 = vector.broadcast %17 : vector<1x32xf32> to vector<16x32xf32>
    %19 = arith.mulf %16, %18 : vector<16x32xf32>
    %c0_7 = arith.constant 0 : index
    %c0_8 = arith.constant 0 : index
    %20 = vector.load %arg3[%c0_7, %c0_8] : memref<1x32xf32, #tpu.memory_space<vmem>>, vector<1x32xf32>
    %21 = vector.broadcast %20 : vector<1x32xf32> to vector<16x32xf32>
    %22 = arith.addf %19, %21 : vector<16x32xf32>
    %c0_9 = arith.constant 0 : index
    %c0_10 = arith.constant 0 : index
    %23 = vector.load %arg4[%c0_9, %c0_10] : memref<16x32xf32, #tpu.memory_space<vmem>>, vector<16x32xf32>
    tpu.vector_store %arg4[%c0_9, %c0_10], %22 {strides = array<i32>} : memref<16x32xf32, #tpu.memory_space<vmem>>, vector<16x32xf32>,
    return
  }
  func.func @transform_0(%arg0: i32) -> (i32, i32) {
    %c0_i32 = arith.constant 0 : i32
    %c0_i32_0 = arith.constant 0 : i32
    return %arg0, %c0_i32 : i32, i32
  }
  func.func @transform_1(%arg0: i32) -> (i32, i32) {
    %c0_i32 = arith.constant 0 : i32
    %c0_i32_0 = arith.constant 0 : i32
    %c0_i32_1 = arith.constant 0 : i32
    return %c0_i32, %c0_i32_0 : i32, i32
  }
  func.func @transform_2(%arg0: i32) -> (i32, i32) {
    %c0_i32 = arith.constant 0 : i32
    %c0_i32_0 = arith.constant 0 : i32
    %c0_i32_1 = arith.constant 0 : i32
    return %c0_i32, %c0_i32_0 : i32, i32
  }
  func.func @transform_3(%arg0: i32) -> (i32, i32) {
    %c0_i32 = arith.constant 0 : i32
    %c0_i32_0 = arith.constant 0 : i32
    return %arg0, %c0_i32 : i32, i32
  }
}

</mosaic_0001>

<bundles_post_ra>
// kernel: tpu_custom_call.1
= control target key start
LH: loop header
LB: loop body
LE: loop exit
PB: predicated region body
PF: predicated region fallthrough
CT: control target
= control target key end

     0   :  { %v3330_v3 = vmov 0.0|0.0   ;;  %vm3331_vm0 = vmmov 0   ;;  %v3332_v8 = vmov 0.0   ;;  %s3889_s0 = inlined_call_operand.vmem [shape: f32[8,128], index: 0, kind: input, shape index: {}]   ;;  %s3890_s1 = inlined_call_operand.vmem [shape: f32[1,128], index: 1, kind: input, shape index: {}]   ;;  %s3891_s2 = inlined_call_operand.vmem [shape: f32[1,128], index: 2, kind: input, shape index: {}]   ;;  %s3892_s3 = inlined_call_operand.vmem [shape: f32[128,4], index: 3, kind: input, shape index: {}]   ;;  %s3893_s4 = inlined_call_operand.vmem [shape: f32[4,128], index: 4, kind: input, shape index: {}]   ;;  %s3894_s5 = inlined_call_operand.hbm [shape: f32[8,128], index: 5, kind: output, shape index: {}]  }
   0x1   :  { %v22_v0 = vld [vmem:[%s3892_s3] sm:$0xff]  ;;  %v23_v1 = vld [vmem:[%s3892_s3 + $0x8] sm:$0xff]  ;;  %v24_v2 = vld [vmem:[%s3892_s3 + $0x10] sm:$0xff]  ;;  %2972 = vmatprep.subr.bf16.mxu0 %v3330_v3  ;;  %2524 = vmatprep.mubr.msk.f32.mxu0 %vm3331_vm0, %v3332_v8 }
   0x2   :  { %v40_v4 = vand.u32 4294901760, %v22_v0  ;;  %v43_v5 = vand.u32 4294901760, %v23_v1  ;;  %v25_v6 = vld [vmem:[%s3892_s3 + $0x18] sm:$0xff]  ;;  %v46_v7 = vand.u32 4294901760, %v24_v2  ;;  %v26_v10 = vld [vmem:[%s3892_s3 + $0x20] sm:$0xff]  ;;  %v27_v11 = vld [vmem:[%s3892_s3 + $0x28] sm:$0xff]  ;;  %2702 = vmatprep.subr.mxu1 %v3332_v8  ;;  %2704 = vmatprep.mubr.msk.f32.mxu1 %vm3331_vm0, %v3332_v8 }
   0x3   :  { %v49_v9 = vand.u32 4294901760, %v25_v6  ;;  %v52_v14 = vand.u32 4294901760, %v26_v10  ;;  %v55_v15 = vand.u32 4294901760, %v27_v11  ;;  %v28_v16 = vld [vmem:[%s3892_s3 + $0x30] sm:$0xff]  ;;  %v29_v17 = vld [vmem:[%s3892_s3 + $0x38] sm:$0xff] }
   0x4   :  { %v3388_v12 = vpack.c.bf16 %v43_v5, %v40_v4 }
   0x5   :  { %v3391_v13 = vpack.c.bf16 %v49_v9, %v46_v7 }
   0x6   :  { %2974 = vmatpush3.bf16.msra.mxu0 %v3388_v12 }
   0x7   :  { %2975 = vmatprep.subr.bf16.mxu0 %v3330_v3 }
   0x8   :  { %10 = vsyncpa [#allocation3], 0  ;;  %v3401_v18 = vpack.c.bf16 %v55_v15, %v52_v14  ;;  %v58_v19 = vand.u32 4294901760, %v28_v16  ;;  %v61_v20 = vand.u32 4294901760, %v29_v17  ;;  %v30_v21 = vld [vmem:[%s3892_s3 + $0x40] sm:$0xff]  ;;  %v31_v23 = vld [vmem:[%s3892_s3 + $0x48] sm:$0xff]  ;;  %v3439_v34 = vsub.f32 %v22_v0, %v40_v4 }
   0x9   :  { %v3409_v22 = vld [vmem:[%s3889_s0] sm:$0xff]  ;;  %v32_v24 = vld [vmem:[%s3892_s3 + $0x50] sm:$0xff]  ;;  %v33_v25 = vld [vmem:[%s3892_s3 + $0x58] sm:$0xff]  ;;  %v64_v27 = vand.u32 4294901760, %v30_v21  ;;  %v67_v33 = vand.u32 4294901760, %v31_v23  ;;  %v3441_v35 = vsub.f32 %v23_v1, %v43_v5  ;;  %v3448_v43 = vsub.f32 %v24_v2, %v46_v7  ;;  %s3333_s30 = smov [#allocation2]  }
   0xa   :  { %2977 = vmatpush3.bf16.msra.mxu0 %v3391_v13  ;;  %v34_v26 = vld [vmem:[%s3892_s3 + $0x60] sm:$0xff]  ;;  %v35_v28 = vld [vmem:[%s3892_s3 + $0x68] sm:$0xff]  ;;  %v36_v29 = vld [vmem:[%s3892_s3 + $0x70] sm:$0xff]  ;;  %v3434_v31 = vand.u32 4294901760, %v3409_v22  ;;  %v3437_v32 = vpack.c.bf16 %v61_v20, %v58_v19  ;;  %v70_v36 = vand.u32 4294901760, %v32_v24  ;;  %v73_v37 = vand.u32 4294901760, %v33_v25 }
   0xb   :  { %2978 = vmatprep.subr.bf16.mxu0 %v3330_v3  ;;  %v37_v30 = vld [vmem:[%s3892_s3 + $0x78] sm:$0xff]  ;;  %v76_v38 = vand.u32 4294901760, %v34_v26  ;;  %v79_v39 = vand.u32 4294901760, %v35_v28  ;;  %v82_v40 = vand.u32 4294901760, %v36_v29  ;;  %v3450_v44 = vsub.f32 %v25_v6, %v49_v9  ;;  %s2254_s6 = sshll.u32 %s3333_s30, 4  ;;  %s2255_s6 = int_to_ptr.vmem [resolvable:$true] %s2254_s6 }
   0xc   :  { %v85_v41 = vand.u32 4294901760, %v37_v30  ;;  %v3446_v42 = vsub.f32 %v3409_v22, %v3434_v31  ;;  %v3453_v45 = vpack.c.bf16 %v67_v33, %v64_v27  ;;  %v133_v46 = vand.u32 4294901760, %v3439_v34  ;;  %s3306_s7 = scalar_lea.vmem %s2255_s6, 128  ;;  %p3311_p1 = scmp.lt.s32.totalorder %s2255_s6, %s2255_s6 }
   0xd   :  { %v140_v47 = vand.u32 4294901760, %v3441_v35  ;;  %v3457_v48 = vsub.f32 %v26_v10, %v52_v14  ;;  %v3460_v49 = vpack.c.bf16 %v73_v37, %v70_v36  ;;  %v3462_v50 = vpack.c.bf16 %v79_v39, %v76_v38  ;;  %p3307_p0 = scmp.ne.s32.totalorder %s2255_s6, %s3306_s7  ;;  %p3312_p2 = scmp.lt.s32.totalorder %s3306_s7, %s3306_s7 }
   0xe   :  { %2980 = vmatpush3.bf16.msra.mxu0 %v3401_v18  ;;  %v3464_v51 = vpack.c.bf16 %v85_v41, %v82_v40  ;;  %v122_v52 = vand.u32 4294901760, %v3446_v42  ;;  %v147_v53 = vand.u32 4294901760, %v3448_v43  ;;  %v154_v54 = vand.u32 4294901760, %v3450_v44 }
   0xf   :  { %2981 = vmatprep.subr.bf16.mxu0 %v3330_v3  ;;  %v3469_v55 = vsub.f32 %v27_v11, %v55_v15  ;;  %v134_v56 = vsub.f32 %v3439_v34, %v133_v46  ;;  %v141_v57 = vsub.f32 %v3441_v35, %v140_v47  ;;  %v161_v58 = vand.u32 4294901760, %v3457_v48  ;;  %p3313_p3 = por %p3312_p2, %p3311_p1 }
  0x10   :  { %v3475_v59 = vsub.f32 %v28_v16, %v58_v19  ;;  %v3478_v60 = vsub.f32 %v29_v17, %v61_v20  ;;  %v3480_v61 = vsub.f32 %v30_v21, %v64_v27  ;;  %v3482_v62 = vsub.f32 %v31_v23, %v67_v33 }
  0x11   :  { %v3484_v63 = vsub.f32 %v32_v24, %v70_v36  ;;  %v3486_v0 = vsub.f32 %v33_v25, %v73_v37  ;;  %v3488_v1 = vsub.f32 %v34_v26, %v76_v38  ;;  %v3490_v2 = vsub.f32 %v35_v28, %v79_v39  ;;  %p3314_p4 = pnand %p3313_p3, %p3307_p0 }
  0x12   :  { %2983 = vmatpush3.bf16.msra.mxu0 %v3437_v32  ;;  %v3492_v4 = vsub.f32 %v36_v29, %v82_v40  ;;  %v123_v5 = vsub.f32 %v3446_v42, %v122_v52  ;;  %v148_v6 = vsub.f32 %v3448_v43, %v147_v53  ;;  %v168_v7 = vand.u32 4294901760, %v3469_v55 }
  0x13   :  { %2984 = vmatprep.subr.bf16.mxu0 %v3330_v3  ;;  %v3499_v9 = vsub.f32 %v37_v30, %v85_v41  ;;  %v135_v10 = vand.u32 4294901760, %v134_v56  ;;  %v142_v11 = vand.u32 4294901760, %v141_v57  ;;  %v155_v14 = vsub.f32 %v3450_v44, %v154_v54 }
  0x14   :  { %v175_v15 = vand.u32 4294901760, %v3475_v59  ;;  %v182_v16 = vand.u32 4294901760, %v3478_v60  ;;  %v189_v17 = vand.u32 4294901760, %v3480_v61  ;;  %v196_v19 = vand.u32 4294901760, %v3482_v62 }
  0x15   :  { %v203_v20 = vand.u32 4294901760, %v3484_v63  ;;  %v210_v21 = vand.u32 4294901760, %v3486_v0  ;;  %v217_v23 = vand.u32 4294901760, %v3488_v1  ;;  %v224_v24 = vand.u32 4294901760, %v3490_v2 }
  0x16   :  { %2986 = vmatpush3.bf16.msra.mxu0 %v3453_v45  ;;  %v231_v25 = vand.u32 4294901760, %v3492_v4  ;;  %v238_v26 = vand.u32 4294901760, %v3499_v9  ;;  %v3514_v27 = vpack.c.bf16 %v140_v47, %v133_v46  ;;  %v3516_v28 = vpack.c.bf16 %v154_v54, %v147_v53 }
  0x17   :  { %2987 = vmatprep.subr.bf16.mxu0 %v3330_v3  ;;  %v3518_v29 = vpack.c.bf16 %v168_v7, %v161_v58  ;;  %v3521_v30 = vpack.c.bf16 %v182_v16, %v175_v15  ;;  %v3523_v33 = vpack.c.bf16 %v196_v19, %v189_v17  ;;  %v3525_v36 = vpack.c.bf16 %v210_v21, %v203_v20 }
  0x18   :  { %v3527_v37 = vpack.c.bf16 %v224_v24, %v217_v23  ;;  %v3530_v38 = vpack.c.bf16 %v238_v26, %v231_v25  ;;  %v124_v39 = vand.u32 4294901760, %v123_v5  ;;  %v162_v40 = vsub.f32 %v3457_v48, %v161_v58 }
  0x19   :  { %v3534_v41 = vpack.c.bf16 %v142_v11, %v135_v10  ;;  %v149_v46 = vand.u32 4294901760, %v148_v6  ;;  %v156_v47 = vand.u32 4294901760, %v155_v14  ;;  %v169_v53 = vsub.f32 %v3469_v55, %v168_v7 }
  0x1a   :  { %2989 = vmatpush3.bf16.msra.mxu0 %v3460_v49  ;;  %v176_v54 = vsub.f32 %v3475_v59, %v175_v15  ;;  %v163_v57 = vand.u32 4294901760, %v162_v40  ;;  %v183_v58 = vsub.f32 %v3478_v60, %v182_v16  ;;  %v190_v11 = vsub.f32 %v3480_v61, %v189_v17 }
  0x1b   :  { %2990 = vmatprep.subr.bf16.mxu0 %v3330_v3  ;;  %v3540_v56 = vpack.c.bf16 %v156_v47, %v149_v46  ;;  %v170_v5 = vand.u32 4294901760, %v169_v53  ;;  %v197_v14 = vsub.f32 %v3482_v62, %v196_v19  ;;  %v204_v15 = vsub.f32 %v3484_v63, %v203_v20 }
  0x1c   :  { %v177_v6 = vand.u32 4294901760, %v176_v54  ;;  %v184_v10 = vand.u32 4294901760, %v183_v58  ;;  %v211_v46 = vsub.f32 %v3486_v0, %v210_v21  ;;  %v218_v47 = vsub.f32 %v3488_v1, %v217_v23 }
  0x1d   :  { %v3547_v7 = vpack.c.bf16 %v170_v5, %v163_v57  ;;  %v198_v40 = vand.u32 4294901760, %v197_v14  ;;  %v205_v19 = vand.u32 4294901760, %v204_v15  ;;  %v225_v20 = vsub.f32 %v3490_v2, %v224_v24 }
  0x1e   :  { %2992 = vmatpush3.bf16.msra.mxu0 %v3462_v50  ;;  %v3554_v16 = vpack.c.bf16 %v184_v10, %v177_v6  ;;  %v212_v53 = vand.u32 4294901760, %v211_v46  ;;  %v232_v54 = vsub.f32 %v3492_v4, %v231_v25  ;;  %v219_v21 = vand.u32 4294901760, %v218_v47 }
  0x1f   :  { %2993 = vmatprep.subr.bf16.mxu0 %v3330_v3  ;;  %v226_v5 = vand.u32 4294901760, %v225_v20  ;;  %v239_v23 = vsub.f32 %v3499_v9, %v238_v26  ;;  %v3581_v26 = vpack.c.bf16 %v3441_v35, %v3439_v34  ;;  %v3588_v10 = vpack.c.bf16 %v3450_v44, %v3448_v43 }
  0x20   :  { %v3566_v57 = vpack.c.bf16 %v212_v53, %v205_v19  ;;  %v233_v6 = vand.u32 4294901760, %v232_v54  ;;  %v3596_v34 = vpack.c.bf16 %v3469_v55, %v3457_v48  ;;  %v3602_v35 = vpack.c.bf16 %v3478_v60, %v3475_v59 }
  0x21   :  { %v3571_v58 = vpack.c.bf16 %v226_v5, %v219_v21  ;;  %v240_v24 = vand.u32 4294901760, %v239_v23  ;;  %v3608_v43 = vpack.c.bf16 %v3482_v62, %v3480_v61  ;;  %v3614_v44 = vpack.c.bf16 %v3486_v0, %v3484_v63 }
  0x22   :  { %2995 = vmatpush3.bf16.msra.mxu0 %v3464_v51  ;;  %v3620_v48 = vpack.c.bf16 %v3490_v2, %v3488_v1  ;;  %v3626_v55 = vpack.c.bf16 %v3499_v9, %v3492_v4  ;;  %vm685_vm1 = vcmask 1043456   ;;  %vm681_vm2 = vcmask 31744  }
  0x23   :  { %2996 = vmatprep.subr.bf16.mxu0 %v3330_v3  ;;  %v3575_v25 = vpack.c.bf16 %v240_v24, %v233_v6 }
  0x25   :  { %2525 = vmatmul.mubr.f32.vlgmr.msra.gmra.mrb[0].mxu0 %v124_v39  ;;  %v191_v39 = vand.u32 4294901760, %v190_v11 }
  0x26   :  { %2998 = vmatpush3.bf16.msra.mxu0 %v3534_v41  ;;  %2559 = vmatprep.mubr.msk.f32.mxu0 %vm3331_vm0, %v3332_v8 }
  0x27   :  { %2999 = vmatprep.subr.bf16.mxu0 %v3330_v3  ;;  %v3560_v17 = vpack.c.bf16 %v198_v40, %v191_v39 }
  0x2a   :  { %3001 = vmatpush3.bf16.msra.mxu0 %v3540_v56 }
  0x2b   :  { %3002 = vmatprep.subr.bf16.mxu0 %v3330_v3 }
  0x2e   :  { %3004 = vmatpush3.bf16.msra.mxu0 %v3547_v7 }
  0x2f   :  { %3005 = vmatprep.subr.bf16.mxu0 %v3330_v3 }
  0x32   :  { %3007 = vmatpush3.bf16.msra.mxu0 %v3554_v16 }
  0x33   :  { %3008 = vmatprep.subr.bf16.mxu0 %v3330_v3 }
  0x36   :  { %3010 = vmatpush3.bf16.msra.mxu0 %v3560_v17 }
  0x37   :  { %3011 = vmatprep.subr.bf16.mxu0 %v3330_v3 }
  0x3a   :  { %3013 = vmatpush3.bf16.msra.mxu0 %v3566_v57 }
  0x3b   :  { %3014 = vmatprep.subr.bf16.mxu0 %v3330_v3 }
  0x3e   :  { %3016 = vmatpush3.bf16.msra.mxu0 %v3571_v58 }
  0x3f   :  { %3017 = vmatprep.subr.bf16.mxu0 %v3330_v3 }
  0x42   :  { %3019 = vmatpush3.bf16.msra.mxu0 %v3575_v25 }
  0x43   :  { %3020 = vmatprep.subr.bf16.mxu0 %v3330_v3 }
  0x45   :  { %2560 = vmatmul.mubr.f32.vlgmr.msra.gmra.mrb[0].mxu0 %v3434_v31 }
  0x46   :  { %3022 = vmatpush3.bf16.msra.mxu0 %v3581_v26  ;;  %2594 = vmatprep.mubr.msk.f32.mxu0 %vm3331_vm0, %v3332_v8 }
  0x47   :  { %3023 = vmatprep.subr.bf16.mxu0 %v3330_v3 }
  0x4a   :  { %3025 = vmatpush3.bf16.msra.mxu0 %v3588_v10 }
  0x4b   :  { %3026 = vmatprep.subr.bf16.mxu0 %v3330_v3 }
  0x4e   :  { %3028 = vmatpush3.bf16.msra.mxu0 %v3596_v34 }
  0x4f   :  { %3029 = vmatprep.subr.bf16.mxu0 %v3330_v3 }
  0x52   :  { %3031 = vmatpush3.bf16.msra.mxu0 %v3602_v35 }
  0x53   :  { %3032 = vmatprep.subr.bf16.mxu0 %v3330_v3 }
  0x56   :  { %3034 = vmatpush3.bf16.msra.mxu0 %v3608_v43 }
  0x57   :  { %3035 = vmatprep.subr.bf16.mxu0 %v3330_v3 }
  0x5a   :  { %3037 = vmatpush3.bf16.msra.mxu0 %v3614_v44 }
  0x5b   :  { %3038 = vmatprep.subr.bf16.mxu0 %v3330_v3 }
  0x5e   :  { %3040 = vmatpush3.bf16.msra.mxu0 %v3620_v48 }
  0x5f   :  { %3041 = vmatprep.subr.bf16.mxu0 %v3330_v3 }
  0x62   :  { %3043 = vmatpush3.bf16.msra.mxu0 %v3626_v55 }
  0x63   :  { %3044 = vmatprep.subr.bf16.mxu0 %v3330_v3 }
  0x65   :  { %2595 = vmatmul.mubr.f32.vlgmr.msra.gmra.mrb[0].mxu0 %v3446_v42  ;;  %v38_v42 = vld [vmem:[%s3893_s4] sm:$0xf] }
  0x66   :  { %3046 = vmatpush3.bf16.msra.mxu0 %v3388_v12  ;;  %2629 = vmatprep.mubr.msk.f32.mxu0 %vm3331_vm0, %v3332_v8 }
  0x67   :  { %3047 = vmatprep.subr.bf16.mxu0 %v3330_v3 }
  0x6a   :  { %3049 = vmatpush3.bf16.msra.mxu0 %v3391_v13 }
  0x6b   :  { %3050 = vmatprep.subr.bf16.mxu0 %v3330_v3 }
  0x6e   :  { %3052 = vmatpush3.bf16.msra.mxu0 %v3401_v18 }
  0x6f   :  { %3053 = vmatprep.subr.bf16.mxu0 %v3330_v3 }
  0x72   :  { %3055 = vmatpush3.bf16.msra.mxu0 %v3437_v32 }
  0x73   :  { %3056 = vmatprep.subr.bf16.mxu0 %v3330_v3 }
  0x76   :  { %3058 = vmatpush3.bf16.msra.mxu0 %v3453_v45 }
  0x77   :  { %3059 = vmatprep.subr.bf16.mxu0 %v3330_v3 }
  0x7a   :  { %3061 = vmatpush3.bf16.msra.mxu0 %v3460_v49 }
  0x7b   :  { %3062 = vmatprep.subr.bf16.mxu0 %v3330_v3 }
  0x7e   :  { %3064 = vmatpush3.bf16.msra.mxu0 %v3462_v50 }
  0x7f   :  { %3065 = vmatprep.subr.bf16.mxu0 %v3330_v3 }
  0x82   :  { %3067 = vmatpush3.bf16.msra.mxu0 %v3464_v51 }
  0x83   :  { %3068 = vmatprep.subr.bf16.mxu0 %v3330_v3 }
  0x85   :  { %2630 = vmatmul.mubr.f32.vlgmr.msra.gmra.mrb[0].mxu0 %v122_v52  ;;  %v687_v52 = vsel %vm685_vm1, %v38_v42, 0 }
  0x86   :  { %3070 = vmatpush3.bf16.msra.mxu0 %v3514_v27  ;;  %2664 = vmatprep.mubr.msk.f32.mxu0 %vm3331_vm0, %v3332_v8  ;;  %v3695_v59 = vand.u32 4294901760, %v687_v52 }
  0x87   :  { %3071 = vmatprep.subr.bf16.mxu0 %v3330_v3 }
  0x88   :  { %2703 = vmatpush3.msra.mxu1 %v3695_v59 }
  0x89   :  { %2707 = vmatprep.subr.mxu1 %v3332_v8 }
  0x8a   :  { %3073 = vmatpush3.bf16.msra.mxu0 %v3516_v28 }
  0x8b   :  { %3074 = vmatprep.subr.bf16.mxu0 %v3330_v3 }
  0x8e   :  { %3076 = vmatpush3.bf16.msra.mxu0 %v3518_v29 }
  0x8f   :  { %3077 = vmatprep.subr.bf16.mxu0 %v3330_v3 }
  0x92   :  { %3079 = vmatpush3.bf16.msra.mxu0 %v3521_v30 }
  0x93   :  { %3080 = vmatprep.subr.bf16.mxu0 %v3330_v3 }
  0x96   :  { %3082 = vmatpush3.bf16.msra.mxu0 %v3523_v33 }
  0x97   :  { %3083 = vmatprep.subr.bf16.mxu0 %v3330_v3 }
  0x9a   :  { %3085 = vmatpush3.bf16.msra.mxu0 %v3525_v36 }
  0x9b   :  { %3086 = vmatprep.subr.bf16.mxu0 %v3330_v3 }
  0x9e   :  { %3088 = vmatpush3.bf16.msra.mxu0 %v3527_v37 }
  0x9f   :  { %3089 = vmatprep.subr.bf16.mxu0 %v3330_v3 }
  0xa2   :  { %3091 = vmatpush3.bf16.msra.mxu0 %v3530_v38 }
  0xa3   :  { %3092 = vmatprep.subr.bf16.mxu0 %v3330_v3 }
  0xa5   :  { %2665 = vmatmul.mubr.f32.vlgmr.msra.gmra.mrb[0].mxu0 %v3434_v31 }
  0xa6   :  { %3094 = vmatpush3.bf16.msra.mxu0 %v3388_v12  ;;  %2699 = vmatprep.mubr.msk.f32.mxu0 %vm3331_vm0, %v3332_v8 }
  0xa7   :  { %3095 = vmatprep.subr.bf16.mxu0 %v3330_v3 }
  0xaa   :  { %3097 = vmatpush3.bf16.msra.mxu0 %v3391_v13 }
  0xab   :  { %3098 = vmatprep.subr.bf16.mxu0 %v3330_v3 }
  0xae   :  { %3100 = vmatpush3.bf16.msra.mxu0 %v3401_v18 }
  0xaf   :  { %3101 = vmatprep.subr.bf16.mxu0 %v3330_v3 }
  0xb2   :  { %3103 = vmatpush3.bf16.msra.mxu0 %v3437_v32 }
  0xb3   :  { %3104 = vmatprep.subr.bf16.mxu0 %v3330_v3 }
  0xb6   :  { %3106 = vmatpush3.bf16.msra.mxu0 %v3453_v45 }
  0xb7   :  { %3107 = vmatprep.subr.bf16.mxu0 %v3330_v3 }
  0xba   :  { %3109 = vmatpush3.bf16.msra.mxu0 %v3460_v49 }
  0xbb   :  { %3110 = vmatprep.subr.bf16.mxu0 %v3330_v3 }
  0xbe   :  { %3112 = vmatpush3.bf16.msra.mxu0 %v3462_v50 }
  0xbf   :  { %3113 = vmatprep.subr.bf16.mxu0 %v3330_v3 }
  0xc2   :  { %3115 = vmatpush3.bf16.msra.mxu0 %v3464_v51 }
  0xc3   :  { %2942 = vmatprep.subr.mxu0 %v3332_v8 }
  0xc5   :  { %2700 = vmatmul.mubr.f32.vlgmr.msra.gmra.mrb[0].mxu0 %v3434_v31  ;;  %v3702_v31 = vsub.f32 %v687_v52, %v3695_v59 }
  0xc6   :  { %2944 = vmatprep.mubr.msk.f32.mxu0 %vm3331_vm0, %v3332_v8  ;;  %2943 = vmatpush3.msra.mxu0 %v3695_v59 }
  0xc7   :  { %2947 = vmatprep.subr.mxu0 %v3332_v8  ;;  %v3706_v0 = vand.u32 4294901760, %v3702_v31 }
  0xc9   :  { %v769_v4 = vsub.f32 %v3702_v31, %v3706_v0 }
  0xcb   :  { %v3710_v14 = vand.u32 4294901760, %v769_v4 }
 0x198   :  { %v676_v60 = vpop.f32.mrb[0].mxu0 }
 0x199   :  { %v680_v61 = vmul.f32 0.03125, %v676_v60  ;;  %v2701_v62 = vpop.f32.mrb[1].mxu0 }
 0x19b   :  { %v683_v63 = vsel %vm681_vm2, %v680_v61, 0 }
 0x19c   :  { %v755_v1 = vand.u32 4294901760, %v683_v63 }
 0x19e   :  { %v756_v2 = vsub.f32 %v683_v63, %v755_v1 }
 0x1a0   :  { %v757_v9 = vand.u32 4294901760, %v756_v2 }
 0x1a2   :  { %v758_v11 = vsub.f32 %v756_v2, %v757_v9 }
 0x1a4   :  { %v759_v15 = vand.u32 4294901760, %v758_v11 }
 0x1a6   :  { %2705 = vmatmul.mubr.f32.vlgmr.msra.gmra.mrb[0].mxu1 %v759_v15 }
 0x1a7   :  { %2708 = vmatpush3.msra.mxu1 %v3710_v14  ;;  %2709 = vmatprep.mubr.msk.f32.mxu1 %vm3331_vm0, %v3332_v8 }
 0x1a8   :  { %2712 = vmatprep.subr.mxu1 %v3332_v8 }
 0x1ae   :  { %2710 = vmatmul.mubr.f32.vlgmr.msra.gmra.mrb[0].mxu1 %v755_v1 }
 0x1af   :  { %2713 = vmatpush3.msra.mxu1 %v3702_v31  ;;  %2714 = vmatprep.mubr.msk.f32.mxu1 %vm3331_vm0, %v3332_v8 }
 0x1b0   :  { %2717 = vmatprep.subr.mxu1 %v3332_v8 }
 0x1b6   :  { %2715 = vmatmul.mubr.f32.vlgmr.msra.gmra.mrb[0].mxu1 %v756_v2 }
 0x1b7   :  { %2718 = vmatpush3.msra.mxu1 %v3695_v59  ;;  %2719 = vmatprep.mubr.msk.f32.mxu1 %vm3331_vm0, %v3332_v8 }
 0x1b8   :  { %2722 = vmatprep.subr.mxu1 %v3332_v8 }
 0x1be   :  { %2720 = vmatmul.mubr.f32.vlgmr.msra.gmra.mrb[0].mxu1 %v757_v9 }
 0x1bf   :  { %2723 = vmatpush3.msra.mxu1 %v3706_v0  ;;  %2724 = vmatprep.mubr.msk.f32.mxu1 %vm3331_vm0, %v3332_v8 }
 0x1c0   :  { %2727 = vmatprep.subr.mxu1 %v3332_v8 }
 0x1c6   :  { %2725 = vmatmul.mubr.f32.vlgmr.msra.gmra.mrb[0].mxu1 %v755_v1 }
 0x1c7   :  { %2728 = vmatpush3.msra.mxu1 %v3695_v59  ;;  %2729 = vmatprep.mubr.msk.f32.mxu1 %vm3331_vm0, %v3332_v8 }
 0x1c8   :  { %3116 = vmatprep.subr.bf16.mxu1 %v3330_v3 }
 0x1ce   :  { %2730 = vmatmul.mubr.f32.vlgmr.msra.gmra.mrb[0].mxu1 %v755_v1 }
 0x1cf   :  { %3118 = vmatpush3.bf16.msra.mxu1 %v3388_v12  ;;  %2764 = vmatprep.mubr.msk.f32.mxu1 %vm3331_vm0, %v3332_v8 }
 0x1d0   :  { %3119 = vmatprep.subr.bf16.mxu1 %v3330_v3 }
 0x1d3   :  { %3121 = vmatpush3.bf16.msra.mxu1 %v3391_v13 }
 0x1d4   :  { %3122 = vmatprep.subr.bf16.mxu1 %v3330_v3 }
 0x1d7   :  { %3124 = vmatpush3.bf16.msra.mxu1 %v3401_v18 }
 0x1d8   :  { %3125 = vmatprep.subr.bf16.mxu1 %v3330_v3 }
 0x1db   :  { %3127 = vmatpush3.bf16.msra.mxu1 %v3437_v32 }
 0x1dc   :  { %3128 = vmatprep.subr.bf16.mxu1 %v3330_v3 }
 0x1df   :  { %3130 = vmatpush3.bf16.msra.mxu1 %v3453_v45 }
 0x1e0   :  { %3131 = vmatprep.subr.bf16.mxu1 %v3330_v3 }
 0x1e3   :  { %3133 = vmatpush3.bf16.msra.mxu1 %v3460_v49 }
 0x1e4   :  { %3134 = vmatprep.subr.bf16.mxu1 %v3330_v3 }
 0x1e7   :  { %3136 = vmatpush3.bf16.msra.mxu1 %v3462_v50 }
 0x1e8   :  { %3137 = vmatprep.subr.bf16.mxu1 %v3330_v3 }
 0x1eb   :  { %3139 = vmatpush3.bf16.msra.mxu1 %v3464_v51 }
 0x1ec   :  { %3140 = vmatprep.subr.bf16.mxu1 %v3330_v3 }
 0x2a1   :  { %v1131_v39 = vpop.f32.mrb[0].mxu1 }
 0x2a2   :  { %v3751_v40 = vsub.f32 %v3409_v22, %v1131_v39  ;;  %v2731_v46 = vpop.f32.mrb[1].mxu1 }
 0x2a4   :  { %v1136_v47 = vmul.f32 %v3751_v40, %v3751_v40 }
 0x2a6   :  { %v3755_v19 = vand.u32 4294901760, %v1136_v47 }
 0x2a8   :  { %v1219_v53 = vsub.f32 %v1136_v47, %v3755_v19 }
 0x2aa   :  { %v1220_v20 = vand.u32 4294901760, %v1219_v53 }
 0x2ac   :  { %v1221_v54 = vsub.f32 %v1219_v53, %v1220_v20 }
 0x2ae   :  { %v1222_v21 = vand.u32 4294901760, %v1221_v54 }
 0x2b0   :  { %2765 = vmatmul.mubr.f32.vlgmr.msra.gmra.mrb[2].mxu1 %v1222_v21 }
 0x2b1   :  { %3142 = vmatpush3.bf16.msra.mxu1 %v3534_v41  ;;  %2799 = vmatprep.mubr.msk.f32.mxu1 %vm3331_vm0, %v3332_v8 }
 0x2b2   :  { %3143 = vmatprep.subr.bf16.mxu1 %v3330_v3 }
 0x2b5   :  { %3145 = vmatpush3.bf16.msra.mxu1 %v3540_v56 }
 0x2b6   :  { %3146 = vmatprep.subr.bf16.mxu1 %v3330_v3 }
 0x2b9   :  { %3148 = vmatpush3.bf16.msra.mxu1 %v3547_v7 }
 0x2ba   :  { %3149 = vmatprep.subr.bf16.mxu1 %v3330_v3 }
 0x2bd   :  { %3151 = vmatpush3.bf16.msra.mxu1 %v3554_v16 }
 0x2be   :  { %3152 = vmatprep.subr.bf16.mxu1 %v3330_v3 }
 0x2c1   :  { %3154 = vmatpush3.bf16.msra.mxu1 %v3560_v17 }
 0x2c2   :  { %3155 = vmatprep.subr.bf16.mxu1 %v3330_v3 }
 0x2c5   :  { %3157 = vmatpush3.bf16.msra.mxu1 %v3566_v57 }
 0x2c6   :  { %3158 = vmatprep.subr.bf16.mxu1 %v3330_v3 }
 0x2c9   :  { %3160 = vmatpush3.bf16.msra.mxu1 %v3571_v58 }
 0x2ca   :  { %3161 = vmatprep.subr.bf16.mxu1 %v3330_v3 }
 0x2cd   :  { %3163 = vmatpush3.bf16.msra.mxu1 %v3575_v25 }
 0x2ce   :  { %3164 = vmatprep.subr.bf16.mxu1 %v3330_v3 }
 0x2d0   :  { %2800 = vmatmul.mubr.f32.vlgmr.msra.gmra.mrb[2].mxu1 %v3755_v19 }
 0x2d1   :  { %3166 = vmatpush3.bf16.msra.mxu1 %v3581_v26  ;;  %2834 = vmatprep.mubr.msk.f32.mxu1 %vm3331_vm0, %v3332_v8 }
 0x2d2   :  { %3167 = vmatprep.subr.bf16.mxu1 %v3330_v3 }
 0x2d5   :  { %3169 = vmatpush3.bf16.msra.mxu1 %v3588_v10 }
 0x2d6   :  { %3170 = vmatprep.subr.bf16.mxu1 %v3330_v3 }
 0x2d9   :  { %3172 = vmatpush3.bf16.msra.mxu1 %v3596_v34 }
 0x2da   :  { %3173 = vmatprep.subr.bf16.mxu1 %v3330_v3 }
 0x2dd   :  { %3175 = vmatpush3.bf16.msra.mxu1 %v3602_v35 }
 0x2de   :  { %3176 = vmatprep.subr.bf16.mxu1 %v3330_v3 }
 0x2e1   :  { %3178 = vmatpush3.bf16.msra.mxu1 %v3608_v43 }
 0x2e2   :  { %3179 = vmatprep.subr.bf16.mxu1 %v3330_v3 }
 0x2e5   :  { %3181 = vmatpush3.bf16.msra.mxu1 %v3614_v44 }
 0x2e6   :  { %3182 = vmatprep.subr.bf16.mxu1 %v3330_v3 }
 0x2e9   :  { %3184 = vmatpush3.bf16.msra.mxu1 %v3620_v48 }
 0x2ea   :  { %3185 = vmatprep.subr.bf16.mxu1 %v3330_v3 }
 0x2ed   :  { %3187 = vmatpush3.bf16.msra.mxu1 %v3626_v55 }
 0x2ee   :  { %3188 = vmatprep.subr.bf16.mxu1 %v3330_v3 }
 0x2f0   :  { %2835 = vmatmul.mubr.f32.vlgmr.msra.gmra.mrb[2].mxu1 %v1219_v53 }
 0x2f1   :  { %3190 = vmatpush3.bf16.msra.mxu1 %v3388_v12  ;;  %2869 = vmatprep.mubr.msk.f32.mxu1 %vm3331_vm0, %v3332_v8 }
 0x2f2   :  { %3191 = vmatprep.subr.bf16.mxu1 %v3330_v3 }
 0x2f5   :  { %3193 = vmatpush3.bf16.msra.mxu1 %v3391_v13 }
 0x2f6   :  { %3194 = vmatprep.subr.bf16.mxu1 %v3330_v3 }
 0x2f9   :  { %3196 = vmatpush3.bf16.msra.mxu1 %v3401_v18 }
 0x2fa   :  { %3197 = vmatprep.subr.bf16.mxu1 %v3330_v3 }
 0x2fd   :  { %3199 = vmatpush3.bf16.msra.mxu1 %v3437_v32 }
 0x2fe   :  { %3200 = vmatprep.subr.bf16.mxu1 %v3330_v3 }
 0x301   :  { %3202 = vmatpush3.bf16.msra.mxu1 %v3453_v45 }
 0x302   :  { %3203 = vmatprep.subr.bf16.mxu1 %v3330_v3 }
 0x305   :  { %3205 = vmatpush3.bf16.msra.mxu1 %v3460_v49 }
 0x306   :  { %3206 = vmatprep.subr.bf16.mxu1 %v3330_v3 }
 0x309   :  { %3208 = vmatpush3.bf16.msra.mxu1 %v3462_v50 }
 0x30a   :  { %3209 = vmatprep.subr.bf16.mxu1 %v3330_v3 }
 0x30d   :  { %3211 = vmatpush3.bf16.msra.mxu1 %v3464_v51 }
 0x30e   :  { %3212 = vmatprep.subr.bf16.mxu1 %v3330_v3 }
 0x310   :  { %2870 = vmatmul.mubr.f32.vlgmr.msra.gmra.mrb[2].mxu1 %v1220_v20 }
 0x311   :  { %3214 = vmatpush3.bf16.msra.mxu1 %v3514_v27  ;;  %2904 = vmatprep.mubr.msk.f32.mxu1 %vm3331_vm0, %v3332_v8 }
 0x312   :  { %3215 = vmatprep.subr.bf16.mxu1 %v3330_v3 }
 0x315   :  { %3217 = vmatpush3.bf16.msra.mxu1 %v3516_v28 }
 0x316   :  { %3218 = vmatprep.subr.bf16.mxu1 %v3330_v3 }
 0x319   :  { %3220 = vmatpush3.bf16.msra.mxu1 %v3518_v29 }
 0x31a   :  { %3221 = vmatprep.subr.bf16.mxu1 %v3330_v3 }
 0x31d   :  { %3223 = vmatpush3.bf16.msra.mxu1 %v3521_v30 }
 0x31e   :  { %3224 = vmatprep.subr.bf16.mxu1 %v3330_v3 }
 0x321   :  { %3226 = vmatpush3.bf16.msra.mxu1 %v3523_v33 }
 0x322   :  { %3227 = vmatprep.subr.bf16.mxu1 %v3330_v3 }
 0x325   :  { %3229 = vmatpush3.bf16.msra.mxu1 %v3525_v36  ;;  %v2263_v36 = vld [vmem:[%s3891_s2] ss:$0 sm:$0xff] }
 0x326   :  { %3230 = vmatprep.subr.bf16.mxu1 %v3330_v3 }
 0x329   :  { %3232 = vmatpush3.bf16.msra.mxu1 %v3527_v37 }
 0x32a   :  { %3233 = vmatprep.subr.bf16.mxu1 %v3330_v3 }
 0x32d   :  { %3235 = vmatpush3.bf16.msra.mxu1 %v3530_v38 }
 0x32e   :  { %3236 = vmatprep.subr.bf16.mxu1 %v3330_v3 }
 0x330   :  { %2905 = vmatmul.mubr.f32.vlgmr.msra.gmra.mrb[2].mxu1 %v3755_v19 }
 0x331   :  { %3238 = vmatpush3.bf16.msra.mxu1 %v3388_v12  ;;  %2939 = vmatprep.mubr.msk.f32.mxu1 %vm3331_vm0, %v3332_v8 }
 0x332   :  { %3239 = vmatprep.subr.bf16.mxu1 %v3330_v3 }
 0x335   :  { %3241 = vmatpush3.bf16.msra.mxu1 %v3391_v13 }
 0x336   :  { %3242 = vmatprep.subr.bf16.mxu1 %v3330_v3 }
 0x339   :  { %3244 = vmatpush3.bf16.msra.mxu1 %v3401_v18 }
 0x33a   :  { %3245 = vmatprep.subr.bf16.mxu1 %v3330_v3 }
 0x33d   :  { %3247 = vmatpush3.bf16.msra.mxu1 %v3437_v32 }
 0x33e   :  { %3248 = vmatprep.subr.bf16.mxu1 %v3330_v3 }
 0x341   :  { %3250 = vmatpush3.bf16.msra.mxu1 %v3453_v45 }
 0x342   :  { %3251 = vmatprep.subr.bf16.mxu1 %v3330_v3 }
 0x345   :  { %3253 = vmatpush3.bf16.msra.mxu1 %v3460_v49 }
 0x346   :  { %3254 = vmatprep.subr.bf16.mxu1 %v3330_v3 }
 0x349   :  { %3256 = vmatpush3.bf16.msra.mxu1 %v3462_v50  ;;  %v2262_v50 = vld [vmem:[%s3890_s1] ss:$0 sm:$0xff] }
 0x34a   :  { %3257 = vmatprep.subr.bf16.mxu1 %v3330_v3 }
 0x34d   :  { %3259 = vmatpush3.bf16.msra.mxu1 %v3464_v51 }
 0x350   :  { %2940 = vmatmul.mubr.f32.vlgmr.msra.gmra.mrb[2].mxu1 %v3755_v19 }
 0x423   :  { %v1774_v12 = vpop.f32.mrb[2].mxu1 }
 0x424   :  { %v1778_v13 = vmul.f32 0.03125, %v1774_v12  ;;  %v2941_v18 = vpop.f32.mrb[3].mxu1 }
 0x426   :  { %v1779_v22 = vadd.f32 1e-06, %v1778_v13 }
 0x428   :  { %3304 = vrsqrt.f32 %v1779_v22 }
 0x432   :  { %v3305_v32 = vpop.eup %3304 }
 0x433   :  { %v1782_v45 = vsel %vm681_vm2, %v3305_v32, 0 }
 0x434   :  { %v1850_v27 = vand.u32 4294901760, %v1782_v45 }
 0x436   :  { %v1851_v49 = vsub.f32 %v1782_v45, %v1850_v27 }
 0x438   :  { %v1852_v28 = vand.u32 4294901760, %v1851_v49 }
 0x43a   :  { %v1853_v29 = vsub.f32 %v1851_v49, %v1852_v28 }
 0x43c   :  { %v1854_v30 = vand.u32 4294901760, %v1853_v29 }
 0x43e   :  { %2945 = vmatmul.mubr.f32.vlgmr.msra.gmra.mrb[2].mxu0 %v1854_v30 }
 0x43f   :  { %2948 = vmatpush3.msra.mxu0 %v3710_v14  ;;  %2949 = vmatprep.mubr.msk.f32.mxu0 %vm3331_vm0, %v3332_v8 }
 0x440   :  { %2952 = vmatprep.subr.mxu0 %v3332_v8 }
 0x446   :  { %2950 = vmatmul.mubr.f32.vlgmr.msra.gmra.mrb[2].mxu0 %v1850_v27 }
 0x447   :  { %2953 = vmatpush3.msra.mxu0 %v3702_v31  ;;  %2954 = vmatprep.mubr.msk.f32.mxu0 %vm3331_vm0, %v3332_v8 }
 0x448   :  { %2957 = vmatprep.subr.mxu0 %v3332_v8 }
 0x44e   :  { %2955 = vmatmul.mubr.f32.vlgmr.msra.gmra.mrb[2].mxu0 %v1851_v49 }
 0x44f   :  { %2958 = vmatpush3.msra.mxu0 %v3695_v59  ;;  %2959 = vmatprep.mubr.msk.f32.mxu0 %vm3331_vm0, %v3332_v8 }
 0x450   :  { %2962 = vmatprep.subr.mxu0 %v3332_v8 }
 0x456   :  { %2960 = vmatmul.mubr.f32.vlgmr.msra.gmra.mrb[2].mxu0 %v1852_v28 }
 0x457   :  { %2963 = vmatpush3.msra.mxu0 %v3706_v0  ;;  %2964 = vmatprep.mubr.msk.f32.mxu0 %vm3331_vm0, %v3332_v8 }
 0x458   :  { %2967 = vmatprep.subr.mxu0 %v3332_v8 }
 0x45e   :  { %2965 = vmatmul.mubr.f32.vlgmr.msra.gmra.mrb[2].mxu0 %v1850_v27 }
 0x45f   :  { %2968 = vmatpush3.msra.mxu0 %v3695_v59  ;;  %2969 = vmatprep.mubr.msk.f32.mxu0 %vm3331_vm0, %v3332_v8 }
 0x466   :  { %2970 = vmatmul.mubr.f32.vlgmr.msra.gmra.mrb[2].mxu0 %v1850_v27 }
 0x539   :  { %v2226_v3 = vpop.f32.mrb[2].mxu0 }
 0x53a   :  { %v2230_v51 = vmul.f32 %v2226_v3, %v3751_v40  ;;  %v2971_v33 = vpop.f32.mrb[3].mxu0 }
 0x53c   :  { %v2238_v37 = vmul.f32 %v2262_v50, %v2230_v51 }
 0x53e   :  { %v2246_v38 = vadd.f32 %v2263_v36, %v2238_v37 }
 0x540   :  { %2247 = vst [vmem:[#allocation2] sm:$0xff] %v2246_v38 }
 0x541   :  { %3317 = shalt.err (!%p3314_p4)
}
 0x542   :  { %s3318_s9 = scalar_lea.hbm %s3894_s5, 128 }
 0x543   :  { %p3319_p5 = scmp.ne.s32.totalorder %s3894_s5, %s3318_s9  ;;  %p3322_p6 = scmp.lt.u32.totalorder %s3318_s9, %s3894_s5 }
 0x545   :  { %p3324_p7 = pnand %p3322_p6, %p3319_p5 }
 0x547   :  { %3327 = shalt.err (!%p3324_p7)
}
 0x548   :  { %2257 = dma.vmem_to_hbm [thread:$0]  %s2255_s6, 128, %s3894_s5, [#allocation3]  }
 0x549   :  { %3328 = dma.done.wait [#allocation3], 128  }
 0x54a   :  { %3329 = vsyncadd [#allocation3], 4294967168 }
 0x54b   :  { %2261 = vsyncpa [#allocation3], 1 }

// kernel: tpu_custom_call.1
= control target key start
LH: loop header
LB: loop body
LE: loop exit
PB: predicated region body
PF: predicated region fallthrough
CT: control target
= control target key end

     0   :  { %8 = vsyncpa [#allocation3], 0  ;;  %s220_s0 = inlined_call_operand.hbm [shape: f32[16,32], index: 0, kind: input, shape index: {}]   ;;  %s221_s1 = inlined_call_operand.vmem [shape: f32[1,32], index: 1, kind: input, shape index: {}]   ;;  %s222_s2 = inlined_call_operand.vmem [shape: f32[1,32], index: 2, kind: input, shape index: {}]   ;;  %s223_s3 = inlined_call_operand.hbm [shape: f32[16,32], index: 3, kind: output, shape index: {}]  }
   0x1   :  { %9 = vsyncpa [#allocation4], 0  ;;  %s154_s12 = smov [#allocation2]   ;;  %s106_s16 = scalar_lea.hbm %s220_s0, 256 }
   0x2   :  { %s15_s13 = sshll.u32 %s154_s12, 4  ;;  %p107_p0 = scmp.ne.s32.totalorder %s220_s0, %s106_s16  ;;  %s16_s13 = int_to_ptr.vmem [resolvable:$true] %s15_s13 }
   0x3   :  { %p110_p1 = scmp.lt.u32.totalorder %s106_s16, %s220_s0 }
   0x5   :  { %p112_p2 = pnand %p110_p1, %p107_p0 }
   0x7   :  { %115 = shalt.err (!%p112_p2)
}
   0x8   :  { %s116_s21 = scalar_lea.vmem %s16_s13, 256  ;;  %p121_p4 = scmp.lt.s32.totalorder %s16_s13, %s16_s13 }
   0x9   :  { %p117_p3 = scmp.ne.s32.totalorder %s16_s13, %s116_s21  ;;  %p122_p5 = scmp.lt.s32.totalorder %s116_s21, %s116_s21 }
   0xb   :  { %p123_p6 = por %p122_p5, %p121_p4 }
   0xd   :  { %p124_p7 = pnand %p123_p6, %p117_p3 }
   0xf   :  { %127 = shalt.err (!%p124_p7)
}
  0x10   :  { %s155_s22 = smov 128   ;;  %s156_s23 = smov 8  }
  0x11   :  { %21 = dma.hbm_to_vmem [thread:$0]  %s220_s0, 256, %s16_s13, [#allocation3], %s155_s22, %s155_s22, %s156_s23  }
  0x12   :  { %150 = dma.done.wait [#allocation3], 256  }
  0x13   :  { %151 = vsyncadd [#allocation3], 4294967040  ;;  %vm31_vm0 = vcmask 261120   ;;  %v29_v0 = vld [vmem:[#allocation2] sm:$0xff]  ;;  %v30_v1 = vld [vmem:[#allocation2 + $0x8] sm:$0xff]  ;;  %s157_s29 = smov [#allocation5]  }
  0x14   :  { %v32_v2 = vsel %vm31_vm0, %v29_v0, 0.0  ;;  %v35_v3 = vsel %vm31_vm0, %v30_v1, 0.0  ;;  %v96_v21 = vld [vmem:[%s221_s1] ss:$0 sm:$0xff]  ;;  %s84_s30 = sshll.u32 %s157_s29, 4  ;;  %s85_s30 = int_to_ptr.vmem [resolvable:$true] %s84_s30 }
  0x15   :  { %33 = vadd.xlane.f32.xlu0 %v32_v2  ;;  %v97_v23 = vld [vmem:[%s222_s2] ss:$0 sm:$0xff]  ;;  %s128_s4 = scalar_lea.vmem %s85_s30, 256  ;;  %p133_p9 = scmp.lt.s32.totalorder %s85_s30, %s85_s30 }
  0x16   :  { %p129_p8 = scmp.ne.s32.totalorder %s85_s30, %s128_s4  ;;  %p134_p10 = scmp.lt.s32.totalorder %s128_s4, %s128_s4 }
  0x18   :  { %p135_p11 = por %p134_p10, %p133_p9 }
  0x19   :  { %36 = vadd.xlane.f32.xlu0 %v35_v3 }
  0x1a   :  { %p136_p12 = pnand %p135_p11, %p129_p8 }
  0xa2   :  { %v34_v4 = vpop.xlane.xlu0 %33 }
  0xa3   :  { %v39_v5 = vmul.f32 0.03125, %v34_v4 }
  0xa5   :  { %v41_v6 = vsub.f32 %v29_v0, %v39_v5 }
  0xa6   :  { %v37_v7 = vpop.xlane.xlu0 %36 }
  0xa7   :  { %v40_v8 = vmul.f32 0.03125, %v37_v7  ;;  %v43_v9 = vmul.f32 %v41_v6, %v41_v6 }
  0xa9   :  { %v42_v10 = vsub.f32 %v30_v1, %v40_v8  ;;  %v45_v11 = vsel %vm31_vm0, %v43_v9, 0.0 }
  0xaa   :  { %46 = vadd.xlane.f32.xlu1 %v45_v11 }
  0xab   :  { %v44_v12 = vmul.f32 %v42_v10, %v42_v10 }
  0xad   :  { %v48_v13 = vsel %vm31_vm0, %v44_v12, 0.0 }
  0xae   :  { %49 = vadd.xlane.f32.xlu1 %v48_v13 }
 0x137   :  { %v47_v14 = vpop.xlane.xlu1 %46 }
 0x138   :  { %v51_v15 = vmul.f32 0.03125, %v47_v14 }
 0x13a   :  { %v53_v16 = vadd.f32 1e-06, %v51_v15 }
 0x13b   :  { %v50_v17 = vpop.xlane.xlu1 %49 }
 0x13c   :  { %102 = vrsqrt.f32 %v53_v16  ;;  %v52_v18 = vmul.f32 0.03125, %v50_v17 }
 0x13e   :  { %v54_v19 = vadd.f32 1e-06, %v52_v18 }
 0x140   :  { %104 = vrsqrt.f32 %v54_v19 }
 0x146   :  { %v103_v20 = vpop.eup %102 }
 0x147   :  { %v57_v22 = vmul.f32 %v103_v20, %v41_v6 }
 0x149   :  { %v66_v24 = vmul.f32 %v96_v21, %v57_v22 }
 0x14a   :  { %v105_v25 = vpop.eup %104 }
 0x14b   :  { %v58_v26 = vmul.f32 %v105_v25, %v42_v10  ;;  %v75_v27 = vadd.f32 %v97_v23, %v66_v24 }
 0x14d   :  { %v67_v28 = vmul.f32 %v96_v21, %v58_v26  ;;  %77 = vst.msk [vmem:[#allocation5] sm:$0xff] %vm31_vm0, %v75_v27 }
 0x14f   :  { %v76_v29 = vadd.f32 %v97_v23, %v67_v28 }
 0x151   :  { %78 = vst.msk [vmem:[#allocation5 + $0x8] sm:$0xff] %vm31_vm0, %v76_v29 }
 0x152   :  { %139 = shalt.err (!%p136_p12)
}
 0x153   :  { %s140_s5 = scalar_lea.hbm %s223_s3, 256 }
 0x154   :  { %p141_p13 = scmp.ne.s32.totalorder %s223_s3, %s140_s5  ;;  %p144_p0 = scmp.lt.u32.totalorder %s140_s5, %s223_s3 }
 0x156   :  { %p146_p1 = pnand %p144_p0, %p141_p13 }
 0x158   :  { %149 = shalt.err (!%p146_p1)
}
 0x159   :  { %90 = dma.vmem_to_hbm [thread:$0]  %s85_s30, 256, %s223_s3, [#allocation4], %s155_s22, %s155_s22, %s156_s23  }
 0x15a   :  { %152 = dma.done.wait [#allocation4], 256  }
 0x15b   :  { %153 = vsyncadd [#allocation4], 4294967040 }
 0x15c   :  { %94 = vsyncpa [#allocation3], 1 }
 0x15d   :  { %95 = vsyncpa [#allocation4], 1 }

</bundles_post_ra>
